<compile_context>
chip_gen: v6e
topology: v6e:2x2x1
jax: 0.10.0
libtpu: 0.0.40
codegen_flags: <defaults>
</compile_context>

<pallas_src>
import functools

import jax
import jax.numpy as jnp
from jax.experimental import pallas as pl
from jax.experimental.pallas import tpu as pltpu

_LANE = 128
_NEG_BIG = -1.0e30  # pad-column bias: exp(_NEG_BIG - m) underflows to exactly 0.0


def _round8(n):
    return ((n + 7) // 8) * 8


def _actor_kernel(num_actions, x_ref, w1_ref, b1_ref, w2_ref, b2_ref, o_ref):
    # fc1 + ReLU (MXU matmul, f32 accumulation); hidden padded to 128 lanes.
    h = jnp.dot(x_ref[...], w1_ref[...], preferred_element_type=jnp.float32)
    h = jnp.maximum(h + b1_ref[...], 0.0)

    # fc2 on the lane-dense (128-wide) padded output slab.
    logits = jnp.dot(h, w2_ref[...], preferred_element_type=jnp.float32)
    logits = logits + b2_ref[...]

    # Numerically stable softmax; pad columns contribute exactly 0.
    m = jnp.max(logits, axis=-1, keepdims=True)
    e = jnp.exp(logits - m)
    denom = jnp.sum(e, axis=-1, keepdims=True)
    # EUP approx reciprocal + one Newton step -> ~f32-exact normalization,
    # still avoids the VALU divide sequence.
    inv = pl.reciprocal(denom, approx=True)
    inv = inv * (2.0 - denom * inv)
    probs = e * inv

    # Store only the real action columns (narrow, contiguous HBM writeback).
    o_ref[...] = probs[:, :num_actions].astype(o_ref.dtype)


def actor_forward(x, w1, b1, w2, b2, *, tb=2048):
    """x: (B, input_size); w1: (input_size, 64); b1: (1, 64);
    w2: (64, num_actions); b2: (1, num_actions). Returns (B, num_actions)."""
    B, in_size = x.shape
    hidden = w1.shape[1]
    num_actions = w2.shape[1]

    # ---- batch tiling: 8-aligned tile; keep >=2 grid steps when batch allows ----
    B8 = _round8(B)
    tb = max(8, (min(int(tb), B8) // 8) * 8)
    if B8 >= 16 and tb >= B8:
        # split into at least 2 tiles so dimension_semantics="parallel" can use
        # both v7x TensorCores (no effect on single-TC v5e/v6e correctness).
        tb = max(8, _round8(B8 // 2))
    Bp = ((B + tb - 1) // tb) * tb
    if Bp != B:
        x = jnp.pad(x, ((0, Bp - B), (0, 0)))

    # ---- pad hidden dim to a full 128-lane width (exact: pads are ReLU(0)=0) ----
    hid_pad = max(_LANE, _round8(hidden))
    hid_pad = ((hid_pad + _LANE - 1) // _LANE) * _LANE
    w1p = jnp.zeros((in_size, hid_pad), w1.dtype).at[:, :hidden].set(w1)
    b1p = jnp.zeros((1, hid_pad), b1.dtype).at[:, :hidden].set(b1)

    # ---- pad fc2 out-dim to 128 lanes for lane-dense in-VMEM compute ----
    n_pad = max(_LANE, ((num_actions + _LANE - 1) // _LANE) * _LANE)
    w2p = jnp.zeros((hid_pad, n_pad), w2.dtype).at[:hidden, :num_actions].set(w2)
    b2p = jnp.full((1, n_pad), _NEG_BIG, b2.dtype).at[:, :num_actions].set(b2)

    grid = (Bp // tb,)

    # ---- VMEM budget: streamed tiles double-buffered, resident weights once ----
    f32 = 4
    x_tile = tb * in_size * f32
    out_tile = tb * num_actions * f32
    weight_bytes = (in_size * hid_pad + hid_pad + hid_pad * n_pad + n_pad) * f32
    vmem_bytes = 2 * (x_tile + out_tile) + weight_bytes + (2 << 20)  # headroom
    vmem_bytes = int(min(max(vmem_bytes, 4 << 20), 48 << 20))

    kernel = functools.partial(_actor_kernel, num_actions)

    out = pl.pallas_call(
        kernel,
        out_shape=jax.ShapeDtypeStruct((Bp, num_actions), jnp.float32),
        grid_spec=pltpu.PrefetchScalarGridSpec(
            num_scalar_prefetch=0,
            grid=grid,
            in_specs=[
                pl.BlockSpec((tb, in_size), lambda i: (i, 0)),         # x tile (streamed)
                pl.BlockSpec((in_size, hid_pad), lambda i: (0, 0)),    # W1 (padded, resident)
                pl.BlockSpec((1, hid_pad), lambda i: (0, 0)),          # b1 (padded)
                pl.BlockSpec((hid_pad, n_pad), lambda i: (0, 0)),      # W2 (padded, resident)
                pl.BlockSpec((1, n_pad), lambda i: (0, 0)),            # b2 (padded)
            ],
            # narrow output: block last dim == full array dim -> legal & contiguous
            out_specs=pl.BlockSpec((tb, num_actions), lambda i: (i, 0)),
        ),
        compiler_params=pltpu.CompilerParams(
            dimension_semantics=("parallel",),  # batch tiles shard across TCs (v7x)
            vmem_limit_bytes=vmem_bytes,
        ),
    )(x, w1p, b1p, w2p, b2p)

    return out[:B]


def init_actor_params(key, input_size, num_actions, hidden=64):
    """Deterministic, PyTorch-Linear-style init (uniform in +/- 1/sqrt(fan_in)).
    Weights returned pre-transposed to (in, out) for the kernel."""
    k1, k2, k3, k4 = jax.random.split(key, 4)
    bound1 = 1.0 / jnp.sqrt(input_size)
    bound2 = 1.0 / jnp.sqrt(hidden)
    # PyTorch stores (out, in); generate that way then transpose.
    w1_pt = jax.random.uniform(k1, (hidden, input_size), jnp.float32, -bound1, bound1)
    b1 = jax.random.uniform(k2, (1, hidden), jnp.float32, -bound1, bound1)
    w2_pt = jax.random.uniform(k3, (num_actions, hidden), jnp.float32, -bound2, bound2)
    b2 = jax.random.uniform(k4, (1, num_actions), jnp.float32, -bound2, bound2)
    return w1_pt.T, b1, w2_pt.T, b2


if __name__ == "__main__":
    # Small but non-trivial shapes: batch not a multiple of the tile, so the
    # pad-and-slice path and a multi-step grid are both exercised.
    batch = 40
    input_size = 32
    num_actions = 8

    key = jax.random.PRNGKey(0)
    kx, kp = jax.random.split(key)
    x = jax.random.normal(kx, (batch, input_size), jnp.float32)
    w1, b1, w2, b2 = init_actor_params(kp, input_size, num_actions)

    # tb=16 -> Bp=48, grid=(3,): multiple pipelined batch tiles even at small B.
    probs = actor_forward(x, w1, b1, w2, b2, tb=16)
    probs = jax.block_until_ready(probs)

    # Reference check in plain JAX.
    h_ref = jnp.maximum(x @ w1 + b1, 0.0)
    ref = jax.nn.softmax(h_ref @ w2 + b2, axis=-1)
    assert probs.shape == (batch, num_actions)
    # Newton-refined reciprocal is ~f32 accurate.
    assert jnp.allclose(probs, ref, atol=1e-4, rtol=1e-4)
    assert jnp.allclose(jnp.sum(probs, axis=-1), 1.0, atol=1e-4)

    print("KERNEL_OK")
</pallas_src>

<mosaic_0001>
module attributes {stable_mosaic.version = 11 : i64} {
  func.func @_actor_kernel(%arg0: i32, %arg1: memref<16x32xf32, #tpu.memory_space<vmem>>, %arg2: memref<32x128xf32, #tpu.memory_space<vmem>>, %arg3: memref<1x128xf32, #tpu.memory_space<vmem>>, %arg4: memref<128x128xf32, #tpu.memory_space<vmem>>, %arg5: memref<1x128xf32, #tpu.memory_space<vmem>>, %arg6: memref<16x8xf32, #tpu.memory_space<vmem>>) attributes {dimension_semantics = [#tpu.dimension_semantics<parallel>], iteration_bounds = array<i64: 3>, scalar_prefetch = 0 : i64, scratch_operands = 0 : i64, tpu.core_type = #tpu.core_type<tc>, window_params = [{transform_indices = @transform_0, window_bounds = array<i64: 16, 32>}, {pipeline_mode = #tpu.pipeline_mode<synchronous>, transform_indices = @transform_1, window_bounds = array<i64: 32, 128>}, {pipeline_mode = #tpu.pipeline_mode<synchronous>, transform_indices = @transform_2, window_bounds = array<i64: 1, 128>}, {pipeline_mode = #tpu.pipeline_mode<synchronous>, transform_indices = @transform_3, window_bounds = array<i64: 128, 128>}, {pipeline_mode = #tpu.pipeline_mode<synchronous>, transform_indices = @transform_4, window_bounds = array<i64: 1, 128>}, {transform_indices = @transform_5, window_bounds = array<i64: 16, 8>}]} {
    %c0 = arith.constant 0 : index
    %c0_0 = arith.constant 0 : index
    %0 = vector.load %arg1[%c0, %c0_0] : memref<16x32xf32, #tpu.memory_space<vmem>>, vector<16x32xf32>
    %c0_1 = arith.constant 0 : index
    %c0_2 = arith.constant 0 : index
    %1 = vector.load %arg2[%c0_1, %c0_2] : memref<32x128xf32, #tpu.memory_space<vmem>>, vector<32x128xf32>
    %cst = arith.constant dense<0.000000e+00> : vector<16x128xf32>
    %2 = tpu.matmul %0, %1, %cst {dimension_numbers = #tpu.dot_dimension_numbers<[1], [0], [0], [1], [0, 0, 1, 1], [], []>} : vector<16x32xf32>, vector<32x128xf32>, vector<16x128xf32> -> vector<16x128xf32>
    %c0_3 = arith.constant 0 : index
    %c0_4 = arith.constant 0 : index
    %3 = vector.load %arg3[%c0_3, %c0_4] : memref<1x128xf32, #tpu.memory_space<vmem>>, vector<1x128xf32>
    %4 = vector.broadcast %3 : vector<1x128xf32> to vector<16x128xf32>
    %5 = arith.addf %2, %4 : vector<16x128xf32>
    %cst_5 = arith.constant 0.000000e+00 : f32
    %6 = vector.broadcast %cst_5 : f32 to vector<16x128xf32>
    %7 = arith.maximumf %5, %6 : vector<16x128xf32>
    %c0_6 = arith.constant 0 : index
    %c0_7 = arith.constant 0 : index
    %8 = vector.load %arg4[%c0_6, %c0_7] : memref<128x128xf32, #tpu.memory_space<vmem>>, vector<128x128xf32>
    %cst_8 = arith.constant dense<0.000000e+00> : vector<16x128xf32>
    %9 = tpu.matmul %7, %8, %cst_8 {dimension_numbers = #tpu.dot_dimension_numbers<[1], [0], [0], [1], [0, 0, 1, 1], [], []>} : vector<16x128xf32>, vector<128x128xf32>, vector<16x128xf32> -> vector<16x128xf32>
    %c0_9 = arith.constant 0 : index
    %c0_10 = arith.constant 0 : index
    %10 = vector.load %arg5[%c0_9, %c0_10] : memref<1x128xf32, #tpu.memory_space<vmem>>, vector<1x128xf32>
    %11 = vector.broadcast %10 : vector<1x128xf32> to vector<16x128xf32>
    %12 = arith.addf %9, %11 : vector<16x128xf32>
    %cst_11 = arith.constant dense<0xFF800000> : vector<16xf32>
    %13 = vector.multi_reduction <maximumf>, %12, %cst_11 [1] : vector<16x128xf32> to vector<16xf32>
    %14 = vector.shape_cast %13 : vector<16xf32> to vector<16x1xf32>
    %15 = vector.broadcast %14 : vector<16x1xf32> to vector<16x128xf32>
    %16 = arith.subf %12, %15 : vector<16x128xf32>
    %17 = math.exp %16 : vector<16x128xf32>
    %cst_12 = arith.constant dense<0.000000e+00> : vector<16xf32>
    %18 = vector.multi_reduction <add>, %17, %cst_12 [1] : vector<16x128xf32> to vector<16xf32>
    %19 = vector.shape_cast %18 : vector<16xf32> to vector<16x1xf32>
    %20 = tpu.reciprocal %19 {approx = true} : vector<16x1xf32> -> vector<16x1xf32>
    %21 = arith.mulf %19, %20 : vector<16x1xf32>
    %cst_13 = arith.constant 2.000000e+00 : f32
    %22 = vector.broadcast %cst_13 : f32 to vector<16x1xf32>
    %23 = arith.subf %22, %21 : vector<16x1xf32>
    %24 = arith.mulf %20, %23 : vector<16x1xf32>
    %25 = vector.broadcast %24 : vector<16x1xf32> to vector<16x128xf32>
    %26 = arith.mulf %17, %25 : vector<16x128xf32>
    %27 = vector.extract_strided_slice %26 {offsets = [0, 0], sizes = [16, 8], strides = [1, 1]} : vector<16x128xf32> to vector<16x8xf32>
    %c0_14 = arith.constant 0 : index
    %c0_15 = arith.constant 0 : index
    %28 = vector.load %arg6[%c0_14, %c0_15] : memref<16x8xf32, #tpu.memory_space<vmem>>, vector<16x8xf32>
    tpu.vector_store %arg6[%c0_14, %c0_15], %27 {strides = array<i32>} : memref<16x8xf32, #tpu.memory_space<vmem>>, vector<16x8xf32>,
    return
  }
  func.func @transform_0(%arg0: i32) -> (i32, i32) {
    %c0_i32 = arith.constant 0 : i32
    %c0_i32_0 = arith.constant 0 : i32
    return %arg0, %c0_i32 : i32, i32
  }
  func.func @transform_1(%arg0: i32) -> (i32, i32) {
    %c0_i32 = arith.constant 0 : i32
    %c0_i32_0 = arith.constant 0 : i32
    %c0_i32_1 = arith.constant 0 : i32
    return %c0_i32, %c0_i32_0 : i32, i32
  }
  func.func @transform_2(%arg0: i32) -> (i32, i32) {
    %c0_i32 = arith.constant 0 : i32
    %c0_i32_0 = arith.constant 0 : i32
    %c0_i32_1 = arith.constant 0 : i32
    return %c0_i32, %c0_i32_0 : i32, i32
  }
  func.func @transform_3(%arg0: i32) -> (i32, i32) {
    %c0_i32 = arith.constant 0 : i32
    %c0_i32_0 = arith.constant 0 : i32
    %c0_i32_1 = arith.constant 0 : i32
    return %c0_i32, %c0_i32_0 : i32, i32
  }
  func.func @transform_4(%arg0: i32) -> (i32, i32) {
    %c0_i32 = arith.constant 0 : i32
    %c0_i32_0 = arith.constant 0 : i32
    %c0_i32_1 = arith.constant 0 : i32
    return %c0_i32, %c0_i32_0 : i32, i32
  }
  func.func @transform_5(%arg0: i32) -> (i32, i32) {
    %c0_i32 = arith.constant 0 : i32
    %c0_i32_0 = arith.constant 0 : i32
    return %arg0, %c0_i32 : i32, i32
  }
}

</mosaic_0001>

<bundles_post_ra>
// kernel: tpu_custom_call.1
= control target key start
LH: loop header
LB: loop body
LE: loop exit
PB: predicated region body
PF: predicated region fallthrough
CT: control target
= control target key end

     0   :  { %10 = vsyncpa [#allocation3], 0  ;;  %s720_s18 = smov 0   ;;  %s785_s0 = inlined_call_operand.vmem [shape: f32[48,32], index: 0, kind: input, shape index: {}]   ;;  %s786_s1 = inlined_call_operand.vmem [shape: f32[32,128], index: 1, kind: input, shape index: {}]   ;;  %s787_s2 = inlined_call_operand.vmem [shape: f32[1,128], index: 2, kind: input, shape index: {}]   ;;  %s788_s3 = inlined_call_operand.hbm [shape: f32[128,128], index: 3, kind: input, shape index: {}]   ;;  %s789_s4 = inlined_call_operand.vmem [shape: f32[1,128], index: 4, kind: input, shape index: {}]   ;;  %s790_s5 = inlined_call_operand.vmem [shape: f32[48,8], index: 5, kind: output, shape index: {}]  }
   0x1 LB: > { %s533_s19 = sadd.s32 4294967295, %s685_s18   ;;  %p535_p0 = scmp.ge.s32.totalorder %s685_s18, 1  ;;  %s685_s18 = sphi %s720_s18, %s16_s18  }
   0x2   : > { %p157_p1 = scmp.lt.s32.totalorder %s685_s18, 4  ;;  %s687_s20 = smov [#allocation2]  }
   0x3   : > { %s175_s21 = sshll.u32 %s687_s20, 4  ;;  %p732_p3 = scmp.eq.s32.totalorder %s533_s19, 0  ;;  %s176_s21 = int_to_ptr.vmem [resolvable:$true] %s175_s21 }
   0x4   : > { %p728_p2 = pnand %p535_p0, %p157_p1  ;;  %s660_s24 = scalar_lea.vmem %s176_s21, 2048 }
   0x5   : > { %p661_p7 = scmp.ne.s32.totalorder %s176_s21, %s660_s24  ;;  %p668_p10 = scmp.lt.s32.totalorder %s176_s21, %s176_s21 }
   0x6   : > { %p624_p4 = pneg %p728_p2  ;;  %p669_p11 = scmp.lt.s32.totalorder %s660_s24, %s660_s24 }
   0x8   : > { %p625_p5 = pnand %p732_p3, %p624_p4  ;;  %p670_p12 = por %p669_p11, %p668_p10 }
   0xa   : > { %p651_p6 = pneg %p625_p5 }
   0xc   : > { %p663_p8 = pnand %p661_p7, %p651_p6 }
   0xe   : > { %p664_p9 = pneg %p663_p8 }
  0x10   : > { %p671_p13 = pnand %p670_p12, %p664_p9 }
  0x12   : > { %674 = shalt.err (!%p671_p13)
}
  0x13   : > { %s688_s25 = smov 128   ;;  %s689_s26 = smov 8  }
  0x14   : > { %627 = dma.hbm_to_vmem [thread:$0]  (!%p625_p5), %s788_s3, 2048, %s176_s21, [#allocation3], %s688_s25, %s688_s25, %s689_s26  }
  0x15   : > { %203 = sbr.rel (%p728_p2) target bundleno = 754 (0x2f2), region = 40 }
  0x1a   : > { %680 = dma.done.wait (%p732_p3), [#allocation3], 2048  }
  0x1b   : > { %682 = vsyncadd (%p732_p3), [#allocation3], 4294965248  ;;  %s540_s29 = sshll.u32 %s533_s19, 1  ;;  %vm256_vm0 = vcmask 261120   ;;  %v248_v0 = vld [vmem:[%s786_s1 + $0x18] sm:$0xff]  ;;  %v247_v1 = vld [vmem:[%s786_s1 + $0x10] sm:$0xff] }
  0x1c   : > { %p232_p0 = scmp.lt.s32.totalorder %s540_s29, 5  ;;  %574 = vmatprep.subr.mxu0 %v248_v0  ;;  %v246_v3 = vld [vmem:[%s786_s1 + $0x8] sm:$0xff]  ;;  %v355_v4 = vld [vmem:[#allocation2 + $0x78] sm:$0xff]  ;;  %v354_v5 = vld [vmem:[#allocation2 + $0x70] sm:$0xff]  ;;  %vm462_vm1 = vcmask 64512  }
  0x1d   : > { %575 = vmatpush3.msra.mxu0 %v248_v0  ;;  %585 = vmatprep.subr.mxu1 %v355_v4  ;;  %v245_v6 = vld [vmem:[%s786_s1] sm:$0xff]  ;;  %v353_v7 = vld [vmem:[#allocation2 + $0x68] sm:$0xff]  ;;  %v351_v10 = vld [vmem:[#allocation2 + $0x58] sm:$0xff] }
  0x1e   : > { %s794_s29 = smov (!%p232_p0, %s540_s29), 5  ;;  %576 = vmatprep.subr.mxu0 %v247_v1  ;;  %586 = vmatpush3.msra.mxu1 %v355_v4  ;;  %v352_v9 = vld [vmem:[#allocation2 + $0x60] sm:$0xff]  ;;  %v350_v11 = vld [vmem:[#allocation2 + $0x50] sm:$0xff]  ;;  %v349_v12 = vld [vmem:[#allocation2 + $0x48] sm:$0xff] }
  0x1f   : > { %s541_s30 = sshll.u32 %s794_s29, 3  ;;  %577 = vmatpush3.msra.mxu0 %v247_v1  ;;  %587 = vmatprep.subr.mxu1 %v354_v5  ;;  %v348_v13 = vld [vmem:[#allocation2 + $0x40] sm:$0xff]  ;;  %v347_v14 = vld [vmem:[#allocation2 + $0x38] sm:$0xff]  ;;  %v346_v15 = vld [vmem:[#allocation2 + $0x30] sm:$0xff] }
  0x20   : > { %s235_s8 = scalar_lea.vmem %s785_s0, %s541_s30  ;;  %578 = vmatprep.subr.mxu0 %v246_v3  ;;  %588 = vmatpush3.msra.mxu1 %v354_v5  ;;  %v345_v16 = vld [vmem:[#allocation2 + $0x28] sm:$0xff]  ;;  %v344_v17 = vld [vmem:[#allocation2 + $0x20] sm:$0xff]  ;;  %v343_v18 = vld [vmem:[#allocation2 + $0x18] sm:$0xff]  ;;  %s241_s24 = scalar_lea.vmem %s790_s5, %s541_s30 }
  0x21   : > { %v243_v2 = vld [vmem:[%s235_s8] sm:$0xff]  ;;  %579 = vmatpush3.msra.mxu0 %v246_v3  ;;  %v244_v8 = vld [vmem:[%s235_s8 + $0x8] sm:$0xff]  ;;  %589 = vmatprep.subr.mxu1 %v353_v7  ;;  %v342_v19 = vld [vmem:[#allocation2 + $0x10] sm:$0xff] }
  0x22   : > { %582 = vmatprep.mubr.msk.f32.mxu0 %vm256_vm0, %v243_v2  ;;  %580 = vmatprep.subr.mxu0 %v245_v6  ;;  %v341_v20 = vld [vmem:[#allocation2 + $0x8] sm:$0xff]  ;;  %v340_v21 = vld [vmem:[#allocation2] sm:$0xff] }
  0x23   : > { %581 = vmatpush3.msra.mxu0 %v245_v6  ;;  %590 = vmatpush3.msra.mxu1 %v353_v7  ;;  %v544_v22 = vld [vmem:[%s787_s2] ss:$0 sm:$0xff] }
  0x24   : > { %583 = vmatmul.mubr.msk.f32.vlgmr.msra.gmra.mxu0 %vm256_vm0, %v244_v8  ;;  %591 = vmatprep.subr.mxu1 %v352_v9  ;;  %v547_v30 = vld [vmem:[%s789_s4] ss:$0 sm:$0xff] }
  0x25   : > { %592 = vmatpush3.msra.mxu1 %v352_v9 }
  0x26   : > { %593 = vmatprep.subr.mxu1 %v351_v10 }
  0x27   : > { %594 = vmatpush3.msra.mxu1 %v351_v10 }
  0x28   : > { %595 = vmatprep.subr.mxu1 %v350_v11 }
  0x29   : > { %596 = vmatpush3.msra.mxu1 %v350_v11 }
  0x2a   : > { %597 = vmatprep.subr.mxu1 %v349_v12 }
  0x2b   : > { %598 = vmatpush3.msra.mxu1 %v349_v12 }
  0x2c   : > { %599 = vmatprep.subr.mxu1 %v348_v13 }
  0x2d   : > { %600 = vmatpush3.msra.mxu1 %v348_v13 }
  0x2e   : > { %601 = vmatprep.subr.mxu1 %v347_v14 }
  0x2f   : > { %602 = vmatpush3.msra.mxu1 %v347_v14 }
  0x30   : > { %603 = vmatprep.subr.mxu1 %v346_v15 }
  0x31   : > { %604 = vmatpush3.msra.mxu1 %v346_v15 }
  0x32   : > { %605 = vmatprep.subr.mxu1 %v345_v16 }
  0x33   : > { %606 = vmatpush3.msra.mxu1 %v345_v16 }
  0x34   : > { %607 = vmatprep.subr.mxu1 %v344_v17 }
  0x35   : > { %608 = vmatpush3.msra.mxu1 %v344_v17 }
  0x36   : > { %609 = vmatprep.subr.mxu1 %v343_v18 }
  0x37   : > { %610 = vmatpush3.msra.mxu1 %v343_v18 }
  0x38   : > { %611 = vmatprep.subr.mxu1 %v342_v19 }
  0x39   : > { %612 = vmatpush3.msra.mxu1 %v342_v19 }
  0x3a   : > { %613 = vmatprep.subr.mxu1 %v341_v20 }
  0x3b   : > { %614 = vmatpush3.msra.mxu1 %v341_v20 }
  0x3c   : > { %615 = vmatprep.subr.mxu1 %v340_v21 }
  0x3d   : > { %616 = vmatpush3.msra.mxu1 %v340_v21 }
  0xe4   : > { %v584_v23 = vpop.f32.mrf.mxu0 }
  0xe5   : > { %v335_v24 = vadd.f32 %v584_v23, %v544_v22 }
  0xe6   : > { %v329_v25 = vpop.f32.mrf.mxu0 }
  0xe7   : > { %v330_v26 = vadd.f32 %v544_v22, %v329_v25  ;;  %v339_v28 = vmax.f32 %v335_v24, 0.0 }
  0xe9   : > { %v338_v27 = vmax.f32 %v330_v26, 0.0 }
  0xeb   : > { %617 = vmatprep.mubr.f32.mxu1 %v338_v27 }
  0xec   : > { %618 = vmatmul.mubr.f32.vlgmr.msra.gmra.mxu1 %v339_v28 }
 0x1ac   : > { %v619_v29 = vpop.f32.mrf.mxu1 }
 0x1ad   : > { %v435_v33 = vadd.f32 %v619_v29, %v547_v30 }
 0x1ae   : > { %v429_v31 = vpop.f32.mrf.mxu1 }
 0x1af   : > { %v430_v32 = vadd.f32 %v547_v30, %v429_v31 }
 0x1b1   : > { %438 = vmax.xlane.f32.xlu0 %v430_v32 }
 0x1b5   : > { %440 = vmax.xlane.f32.xlu0 %v435_v33 }
 0x23a   : > { %v439_v34 = vpop.xlane.xlu0 %438 }
 0x23b   : > { %v442_v35 = vsub.f32 %v430_v32, %v439_v34 }
 0x23d   : > { %v444_v36 = vmul.f32 1.442695, %v442_v35 }
 0x23e   : > { %v441_v37 = vpop.xlane.xlu0 %440 }
 0x23f   : > { %641 = vpow2.f32 %v444_v36  ;;  %v443_v38 = vsub.f32 %v435_v33, %v441_v37 }
 0x241   : > { %v446_v39 = vmul.f32 1.442695, %v443_v38 }
 0x243   : > { %643 = vpow2.f32 %v446_v39 }
 0x24c   : > { %v642_v40 = vpop.eup %641 }
 0x24d   : > { %448 = vadd.xlane.f32.xlu1 %v642_v40 }
 0x250   : > { %v644_v41 = vpop.eup %643 }
 0x251   : > { %450 = vadd.xlane.f32.xlu1 %v644_v41 }
 0x2d6   : > { %v449_v42 = vpop.xlane.xlu1 %448 }
 0x2d7   : > { %645 = vrcp.f32 %v449_v42 }
 0x2da   : > { %v451_v43 = vpop.xlane.xlu1 %450 }
 0x2db   : > { %647 = vrcp.f32 %v451_v43 }
 0x2e4   : > { %v646_v44 = vpop.eup %645 }
 0x2e5   : > { %v454_v45 = vmul.f32 %v646_v44, %v449_v42 }
 0x2e7   : > { %v456_v46 = vsub.f32 2.0, %v454_v45 }
 0x2e8   : > { %v648_v47 = vpop.eup %647 }
 0x2e9   : > { %v458_v48 = vmul.f32 %v646_v44, %v456_v46  ;;  %v455_v49 = vmul.f32 %v648_v47, %v451_v43 }
 0x2eb   : > { %v460_v50 = vmul.f32 %v642_v40, %v458_v48  ;;  %v457_v51 = vsub.f32 2.0, %v455_v49 }
 0x2ed   : > { %463 = vst.msk [vmem:[%s241_s24] sm:$0xff] %vm462_vm1, %v460_v50  ;;  %v459_v52 = vmul.f32 %v648_v47, %v457_v51 }
 0x2ef   : > { %v461_v53 = vmul.f32 %v644_v41, %v459_v52 }
 0x2f1   : > { %464 = vst.msk [vmem:[%s241_s24 + $0x8] sm:$0xff] %vm462_vm1, %v461_v53 }
 0x2f2 PF: > { %s16_s18 = sadd.s32 1, %s685_s18  }
 0x2f3   : > { %p13_p1 = scmp.ge.s32.totalorder %s16_s18, 5  }
 0x2f5   :  { %15 = sbr.rel (!%p13_p1) target bundleno = 1 (0x1), region = 75 }
 0x2fa   :  { %487 = vsyncpa [#allocation3], 1 }
 0x2fb   :  { %489 = vsyncpa [#allocation3 + $0x1], 1 }

</bundles_post_ra>
